<compile_context>
chip_gen: v5e
topology: v5e:2x2
jax: 0.10.0
libtpu: 0.0.40
codegen_flags: <defaults>
</compile_context>

<pallas_src>
import math

import jax
import jax.numpy as jnp
from jax import lax
from jax.experimental import pallas as pl
from jax.experimental.pallas import tpu as pltpu


# --------------------------------------------------------------------------
# Small helpers
# --------------------------------------------------------------------------
def _round_up(x, m):
    return ((x + m - 1) // m) * m


def _cdiv(a, b):
    return -(-a // b)


def _padded_block_bytes(r, c, dtype):
    """VMEM footprint of an (r, c) tile, accounting for (sublane, lane) padding."""
    itemsize = jnp.dtype(dtype).itemsize
    sublane = max(8, 32 // max(itemsize, 1))   # 8 for f32, 16 for bf16, 32 for i8
    return _round_up(max(r, 1), sublane) * _round_up(max(c, 1), 128) * itemsize


def _vregs(r, c):
    """Approximate f32 vreg count of an (r, c) value."""
    return _cdiv(max(r, 1), 8) * _cdiv(max(c, 1), 128)


def _tpu_target_info():
    """(vmem_capacity_bytes, num_tensorcores) with defensive fallbacks."""
    vmem_bytes = None
    num_cores = None
    try:
        info = pltpu.get_tpu_info()
        v = int(getattr(info, "vmem_capacity_bytes", 0) or 0)
        if v > 0:
            vmem_bytes = v
        for attr in ("num_tensorcores", "tensorcore_count", "num_cores", "core_count"):
            c = getattr(info, attr, None)
            if isinstance(c, int) and c > 0:
                num_cores = c
                break
    except Exception:
        pass
    kind = ""
    try:
        kind = jax.devices()[0].device_kind.lower()
    except Exception:
        pass
    if vmem_bytes is None:
        vmem_bytes = (64 << 20) if "7" in kind else (128 << 20)
    if num_cores is None:
        num_cores = 2 if (("v4" in kind) or ("v5p" in kind) or ("7x" in kind)) else 1
    return vmem_bytes, num_cores


# --------------------------------------------------------------------------
# Kernel
# --------------------------------------------------------------------------
def _make_qk_kernel(tb, tb_inner, shared, compute_dtype, precision):
    """Fused q/k batched-matmul kernel over a (TB, ...) batch block.

    Per-batch refs:  (TB, M, K) / (TB, K, N);  shared refs: (1, r, c).
    Outputs: q_ref, k_ref : (TB, M, N).
    """
    n_full = tb // tb_inner
    rem = tb % tb_inner
    unroll = True if n_full <= 8 else 4

    dot_kwargs = dict(preferred_element_type=jnp.float32)
    if precision is not None:
        dot_kwargs["precision"] = precision

    def kernel(x1_ref, x2_ref, x3_ref, x4_ref, q_ref, k_ref):
        def prep_shared(ref):
            v = ref[0]
            if compute_dtype is not None:
                v = v.astype(compute_dtype)
            # Hoisted once per grid step (JAX does not CSE broadcasts).
            return jnp.broadcast_to(v[None], (tb_inner,) + v.shape)

        in_refs = (x1_ref, x2_ref, x3_ref, x4_ref)
        consts = [prep_shared(r) if s else None for r, s in zip(in_refs, shared)]

        def load(ref, const, idx, cnt):
            if const is not None:
                return const[:cnt] if cnt != tb_inner else const
            v = ref[idx]
            if compute_dtype is not None:
                v = v.astype(compute_dtype)
            return v

        def chunk(start, cnt):
            idx = pl.ds(start, cnt)
            a1 = load(x1_ref, consts[0], idx, cnt)
            b1 = load(x2_ref, consts[1], idx, cnt)
            a2 = load(x3_ref, consts[2], idx, cnt)
            b2 = load(x4_ref, consts[3], idx, cnt)
            # Batched MXU matmuls with f32 accumulation.
            q = jnp.einsum("bmk,bkn->bmn", a1, b1, **dot_kwargs)
            k = jnp.einsum("bmk,bkn->bmn", a2, b2, **dot_kwargs)
            # Back-to-back stores of both outputs for this batch chunk.
            q_ref[idx] = q.astype(q_ref.dtype)
            k_ref[idx] = k.astype(k_ref.dtype)

        if n_full == 1:
            chunk(0, tb_inner)
        elif n_full > 1:
            def body(i, carry):
                start = pl.multiple_of(i * tb_inner, tb_inner)
                chunk(start, tb_inner)
                return carry
            lax.fori_loop(0, n_full, body, 0, unroll=unroll)
        if rem:
            chunk(n_full * tb_inner, rem)

    return kernel


# --------------------------------------------------------------------------
# pallas_call wrapper
# --------------------------------------------------------------------------
def _batched_qk(x1f, x2f, x3f, x4f, shared, BN, q_dtype, k_dtype,
                compute_dtype=None, precision=None):
    """x*f are (BN, r, c) per-batch or (1, r, c) shared; returns (q, k)."""
    M, K = x1f.shape[-2:]
    N = x2f.shape[-1]
    operands = (x1f, x2f, x3f, x4f)

    vmem_bytes, num_cores = _tpu_target_info()

    # --- VMEM / vreg budgets (true per-operand itemsizes) -------------------
    per_batch_bytes, fixed_bytes = 0, 0
    per_batch_vr, fixed_vr = 2 * _vregs(M, N), 0
    for op, sh in zip(operands, shared):
        b = _padded_block_bytes(op.shape[-2], op.shape[-1], op.dtype)
        v = _vregs(op.shape[-2], op.shape[-1])
        if sh:
            fixed_bytes += b
            fixed_vr += v
        else:
            per_batch_bytes += b
            per_batch_vr += v
    per_batch_bytes += _padded_block_bytes(M, N, q_dtype)
    per_batch_bytes += _padded_block_bytes(M, N, k_dtype)

    tb_inner_max = 1
    for t in (8, 4, 2):
        if t * per_batch_vr + fixed_vr <= 48:   # keep live vregs well under 64
            tb_inner_max = t
            break

    # --- Tiling -------------------------------------------------------------
    budget = int(vmem_bytes * 0.38)             # single block-set (x2 buffering)
    avail = max(budget - fixed_bytes, per_batch_bytes)
    cap = max(1, avail // per_batch_bytes)

    steps = _cdiv(BN, cap)
    if num_cores > 1 and BN >= 8:
        steps = _round_up(max(steps, num_cores), num_cores)   # balanced megacore
    TB = min(BN, _cdiv(BN, steps))
    if BN % TB != 0:
        # Prefer an exact divisor of BN (no masked tail) if it does not more
        # than double the step count nor break the per-core balance.
        d = next((d for d in range(TB, 0, -1) if BN % d == 0), TB)
        if d * 2 >= TB and (num_cores <= 1 or _cdiv(BN, d) % num_cores == 0):
            TB = d
    steps = _cdiv(BN, TB)

    tb_inner = min(tb_inner_max, TB)

    blockset_bytes = TB * per_batch_bytes + fixed_bytes
    vmem_limit = int(min(vmem_bytes * 0.85,
                         max(2 * blockset_bytes + (8 << 20), 32 << 20)))

    # --- Specs ----------------------------------------------------------------
    def in_spec(op, sh):
        r, c = op.shape[-2:]
        if sh:
            return pl.BlockSpec((1, r, c), lambda b: (0, 0, 0))
        return pl.BlockSpec((TB, r, c), lambda b: (b, 0, 0))

    in_specs = [in_spec(op, sh) for op, sh in zip(operands, shared)]
    out_spec = pl.BlockSpec((TB, M, N), lambda b: (b, 0, 0))

    q, k = pl.pallas_call(
        _make_qk_kernel(TB, tb_inner, shared, compute_dtype, precision),
        out_shape=(
            jax.ShapeDtypeStruct((BN, M, N), q_dtype),
            jax.ShapeDtypeStruct((BN, M, N), k_dtype),
        ),
        grid_spec=pltpu.PrefetchScalarGridSpec(
            num_scalar_prefetch=0,
            grid=(steps,),
            in_specs=in_specs,
            out_specs=[out_spec, out_spec],
        ),
        compiler_params=pltpu.CompilerParams(
            dimension_semantics=("parallel",),
            vmem_limit_bytes=vmem_limit,
        ),
    )(x1f, x2f, x3f, x4f)
    return q, k


# --------------------------------------------------------------------------
# Public wrapper (mirrors Model.forward semantics)
# --------------------------------------------------------------------------
def model_forward(x1, x2, x3, x4, *, compute_dtype=None, precision=None,
                  force_pallas=False, small_bytes_threshold=512 * 1024):
    """JAX/Pallas equivalent of Model.forward's computation.

    Returns (q, k, v) with v aliasing k (mirrors `v = k`).  The original
    PyTorch forward has no return; we expose the computed tensors so the
    kernel result is observable.  Pass precision=jax.lax.Precision.HIGHEST
    for exact fp32 MXU accumulation if needed.
    """
    x1, x2, x3, x4 = (jnp.asarray(v) for v in (x1, x2, x3, x4))

    # TODO(synk): 1-D operands and q/k products with diverging batch/M/K/N are
    # not handled by the fused kernel; they fall back to jnp.matmul below.
    fusable = all(v.ndim >= 2 for v in (x1, x2, x3, x4))
    if fusable:
        batch_q = jnp.broadcast_shapes(x1.shape[:-2], x2.shape[:-2])
        batch_k = jnp.broadcast_shapes(x3.shape[:-2], x4.shape[:-2])
        M, K = x1.shape[-2:]
        N = x2.shape[-1]
        fusable = (batch_q == batch_k
                   and x2.shape[-2] == K
                   and x3.shape[-2:] == (M, K)
                   and x4.shape[-2:] == (K, N))

    total_in_bytes = sum(int(v.size) * jnp.dtype(v.dtype).itemsize
                         for v in (x1, x2, x3, x4))
    if not fusable or (not force_pallas and total_in_bytes < small_bytes_threshold):
        # Small-problem / non-fusable bailout: fixed pallas_call overhead
        # dominates at these sizes; XLA's fused batched dot is faster.
        q = jnp.matmul(x1, x2, precision=precision)
        k = jnp.matmul(x3, x4, precision=precision)
        return q, k, k

    BN = math.prod(batch_q) if batch_q else 1

    def prep(x):
        ob = tuple(x.shape[:-2])
        if ob == tuple(batch_q):
            return x.reshape((BN,) + x.shape[-2:]), False       # per-batch
        if math.prod(ob) == 1:
            # Shared across the whole batch: keep the single HBM copy.
            return x.reshape((1,) + x.shape[-2:]), True
        # Partial broadcast (rare): materialize.
        # TODO(synk): could be expressed with a per-axis index_map instead.
        xb = jnp.broadcast_to(x, tuple(batch_q) + x.shape[-2:])
        return xb.reshape((BN,) + x.shape[-2:]), False

    (x1f, s1), (x2f, s2), (x3f, s3), (x4f, s4) = (prep(v) for v in (x1, x2, x3, x4))

    q_dtype = jnp.result_type(x1.dtype, x2.dtype)
    k_dtype = jnp.result_type(x3.dtype, x4.dtype)

    q, k = _batched_qk(x1f, x2f, x3f, x4f, (s1, s2, s3, s4), BN,
                       q_dtype, k_dtype, compute_dtype, precision)
    q = q.reshape(tuple(batch_q) + (M, N))
    k = k.reshape(tuple(batch_q) + (M, N))
    return q, k, k  # v = k (alias)


# --------------------------------------------------------------------------
# Self-test
# --------------------------------------------------------------------------
if __name__ == "__main__":
    key = jax.random.PRNGKey(0)
    k1, k2, k3, k4 = jax.random.split(key, 4)

    B, H, M, K, N = 2, 4, 8, 32, 16
    x1 = jax.random.normal(k1, (B, H, M, K), dtype=jnp.float32)
    x2 = jax.random.normal(k2, (B, H, K, N), dtype=jnp.float32)
    x3 = jax.random.normal(k3, (B, H, M, K), dtype=jnp.float32)
    x4 = jax.random.normal(k4, (B, H, K, N), dtype=jnp.float32)

    # Pallas path (forced; the default would take the small-problem bailout).
    q, k, v = model_forward(x1, x2, x3, x4, force_pallas=True)
    jax.block_until_ready((q, k, v))
    assert jnp.allclose(q, jnp.matmul(x1, x2), atol=1e-5, rtol=1e-5)
    assert jnp.allclose(k, jnp.matmul(x3, x4), atol=1e-5, rtol=1e-5)
    assert v is k

    # Non-power-of-two batch: exercises divisor snapping / multi-step grid /
    # ragged inner chunk (and the masked tail block on 2-core chips).
    B2, H2 = 3, 7
    y1 = jax.random.normal(k1, (B2, H2, M, K), dtype=jnp.float32)
    y2 = jax.random.normal(k2, (B2, H2, K, N), dtype=jnp.float32)
    y3 = jax.random.normal(k3, (B2, H2, M, K), dtype=jnp.float32)
    y4 = jax.random.normal(k4, (B2, H2, K, N), dtype=jnp.float32)
    q2, kk2, v2 = model_forward(y1, y2, y3, y4, force_pallas=True)
    jax.block_until_ready((q2, kk2, v2))
    assert jnp.allclose(q2, jnp.matmul(y1, y2), atol=1e-5, rtol=1e-5)
    assert jnp.allclose(kk2, jnp.matmul(y3, y4), atol=1e-5, rtol=1e-5)
    assert v2 is kk2

    # Broadcast operand (x2 shared across the batch): no HBM replication.
    z2 = jax.random.normal(k2, (K, N), dtype=jnp.float32)
    q3, k3_out, v3 = model_forward(x1, z2, x3, x4, force_pallas=True)
    jax.block_until_ready((q3, k3_out, v3))
    assert jnp.allclose(q3, jnp.matmul(x1, z2), atol=1e-5, rtol=1e-5)
    assert jnp.allclose(k3_out, jnp.matmul(x3, x4), atol=1e-5, rtol=1e-5)

    # Default (auto) path: tiny problems bypass pallas_call entirely.
    qs, ks, vs = model_forward(x1, x2, x3, x4)
    jax.block_until_ready((qs, ks, vs))
    assert jnp.allclose(qs, q, atol=1e-6, rtol=1e-6)
    assert jnp.allclose(ks, k, atol=1e-6, rtol=1e-6)

    print("KERNEL_OK")
</pallas_src>

<mosaic_0001>
module attributes {stable_mosaic.version = 11 : i64} {
  func.func @kernel(%arg0: i32, %arg1: memref<8x8x32xf32, #tpu.memory_space<vmem>>, %arg2: memref<8x32x16xf32, #tpu.memory_space<vmem>>, %arg3: memref<8x8x32xf32, #tpu.memory_space<vmem>>, %arg4: memref<8x32x16xf32, #tpu.memory_space<vmem>>, %arg5: memref<8x8x16xf32, #tpu.memory_space<vmem>>, %arg6: memref<8x8x16xf32, #tpu.memory_space<vmem>>) attributes {dimension_semantics = [#tpu.dimension_semantics<parallel>], iteration_bounds = array<i64: 1>, scalar_prefetch = 0 : i64, scratch_operands = 0 : i64, tpu.core_type = #tpu.core_type<tc>, window_params = [{transform_indices = @transform_0, window_bounds = array<i64: 8, 8, 32>}, {transform_indices = @transform_1, window_bounds = array<i64: 8, 32, 16>}, {transform_indices = @transform_2, window_bounds = array<i64: 8, 8, 32>}, {transform_indices = @transform_3, window_bounds = array<i64: 8, 32, 16>}, {transform_indices = @transform_4, window_bounds = array<i64: 8, 8, 16>}, {transform_indices = @transform_5, window_bounds = array<i64: 8, 8, 16>}]} {
    %c0_i32 = arith.constant 0 : i32
    %c4_i32 = arith.constant 4 : i32
    %0 = arith.muli %c0_i32, %c4_i32 : i32
    %1 = tpu.assume_multiple %0, 4 : i32
    %2 = arith.index_cast %1 : i32 to index
    %c0 = arith.constant 0 : index
    %c0_0 = arith.constant 0 : index
    %3 = vector.load %arg1[%2, %c0, %c0_0] : memref<8x8x32xf32, #tpu.memory_space<vmem>>, vector<4x8x32xf32>
    %4 = arith.index_cast %1 : i32 to index
    %c0_1 = arith.constant 0 : index
    %c0_2 = arith.constant 0 : index
    %5 = vector.load %arg2[%4, %c0_1, %c0_2] : memref<8x32x16xf32, #tpu.memory_space<vmem>>, vector<4x32x16xf32>
    %6 = arith.index_cast %1 : i32 to index
    %c0_3 = arith.constant 0 : index
    %c0_4 = arith.constant 0 : index
    %7 = vector.load %arg3[%6, %c0_3, %c0_4] : memref<8x8x32xf32, #tpu.memory_space<vmem>>, vector<4x8x32xf32>
    %8 = arith.index_cast %1 : i32 to index
    %c0_5 = arith.constant 0 : index
    %c0_6 = arith.constant 0 : index
    %9 = vector.load %arg4[%8, %c0_5, %c0_6] : memref<8x32x16xf32, #tpu.memory_space<vmem>>, vector<4x32x16xf32>
    "tpu.trace_start"() <{level = 10 : i32, message = "bmk,bkn->bmn"}> : () -> ()
    %cst = arith.constant dense<0.000000e+00> : vector<4x8x16xf32>
    %10 = tpu.matmul %3, %5, %cst {dimension_numbers = #tpu.dot_dimension_numbers<[2], [1], [1], [2], [0, 0, 0, 1, 1, 2], [0], [0]>} : vector<4x8x32xf32>, vector<4x32x16xf32>, vector<4x8x16xf32> -> vector<4x8x16xf32>
    %cst_7 = arith.constant dense<0.000000e+00> : vector<4x8x16xf32>
    %11 = tpu.matmul %7, %9, %cst_7 {dimension_numbers = #tpu.dot_dimension_numbers<[2], [1], [1], [2], [0, 0, 0, 1, 1, 2], [0], [0]>} : vector<4x8x32xf32>, vector<4x32x16xf32>, vector<4x8x16xf32> -> vector<4x8x16xf32>
    "tpu.trace_stop"() : () -> ()
    %12 = arith.index_cast %1 : i32 to index
    %c0_8 = arith.constant 0 : index
    %c0_9 = arith.constant 0 : index
    %13 = vector.load %arg5[%12, %c0_8, %c0_9] : memref<8x8x16xf32, #tpu.memory_space<vmem>>, vector<4x8x16xf32>
    tpu.vector_store %arg5[%12, %c0_8, %c0_9], %10 {strides = array<i32>} : memref<8x8x16xf32, #tpu.memory_space<vmem>>, vector<4x8x16xf32>,
    %14 = arith.index_cast %1 : i32 to index
    %c0_10 = arith.constant 0 : index
    %c0_11 = arith.constant 0 : index
    %15 = vector.load %arg6[%14, %c0_10, %c0_11] : memref<8x8x16xf32, #tpu.memory_space<vmem>>, vector<4x8x16xf32>
    tpu.vector_store %arg6[%14, %c0_10, %c0_11], %11 {strides = array<i32>} : memref<8x8x16xf32, #tpu.memory_space<vmem>>, vector<4x8x16xf32>,
    %c1_i32 = arith.constant 1 : i32
    %c4_i32_12 = arith.constant 4 : i32
    %16 = arith.muli %c1_i32, %c4_i32_12 : i32
    %17 = tpu.assume_multiple %16, 4 : i32
    %18 = arith.index_cast %17 : i32 to index
    %c0_13 = arith.constant 0 : index
    %c0_14 = arith.constant 0 : index
    %19 = vector.load %arg1[%18, %c0_13, %c0_14] : memref<8x8x32xf32, #tpu.memory_space<vmem>>, vector<4x8x32xf32>
    %20 = arith.index_cast %17 : i32 to index
    %c0_15 = arith.constant 0 : index
    %c0_16 = arith.constant 0 : index
    %21 = vector.load %arg2[%20, %c0_15, %c0_16] : memref<8x32x16xf32, #tpu.memory_space<vmem>>, vector<4x32x16xf32>
    %22 = arith.index_cast %17 : i32 to index
    %c0_17 = arith.constant 0 : index
    %c0_18 = arith.constant 0 : index
    %23 = vector.load %arg3[%22, %c0_17, %c0_18] : memref<8x8x32xf32, #tpu.memory_space<vmem>>, vector<4x8x32xf32>
    %24 = arith.index_cast %17 : i32 to index
    %c0_19 = arith.constant 0 : index
    %c0_20 = arith.constant 0 : index
    %25 = vector.load %arg4[%24, %c0_19, %c0_20] : memref<8x32x16xf32, #tpu.memory_space<vmem>>, vector<4x32x16xf32>
    "tpu.trace_start"() <{level = 10 : i32, message = "bmk,bkn->bmn"}> : () -> ()
    %cst_21 = arith.constant dense<0.000000e+00> : vector<4x8x16xf32>
    %26 = tpu.matmul %19, %21, %cst_21 {dimension_numbers = #tpu.dot_dimension_numbers<[2], [1], [1], [2], [0, 0, 0, 1, 1, 2], [0], [0]>} : vector<4x8x32xf32>, vector<4x32x16xf32>, vector<4x8x16xf32> -> vector<4x8x16xf32>
    %cst_22 = arith.constant dense<0.000000e+00> : vector<4x8x16xf32>
    %27 = tpu.matmul %23, %25, %cst_22 {dimension_numbers = #tpu.dot_dimension_numbers<[2], [1], [1], [2], [0, 0, 0, 1, 1, 2], [0], [0]>} : vector<4x8x32xf32>, vector<4x32x16xf32>, vector<4x8x16xf32> -> vector<4x8x16xf32>
    "tpu.trace_stop"() : () -> ()
    %28 = arith.index_cast %17 : i32 to index
    %c0_23 = arith.constant 0 : index
    %c0_24 = arith.constant 0 : index
    %29 = vector.load %arg5[%28, %c0_23, %c0_24] : memref<8x8x16xf32, #tpu.memory_space<vmem>>, vector<4x8x16xf32>
    tpu.vector_store %arg5[%28, %c0_23, %c0_24], %26 {strides = array<i32>} : memref<8x8x16xf32, #tpu.memory_space<vmem>>, vector<4x8x16xf32>,
    %30 = arith.index_cast %17 : i32 to index
    %c0_25 = arith.constant 0 : index
    %c0_26 = arith.constant 0 : index
    %31 = vector.load %arg6[%30, %c0_25, %c0_26] : memref<8x8x16xf32, #tpu.memory_space<vmem>>, vector<4x8x16xf32>
    tpu.vector_store %arg6[%30, %c0_25, %c0_26], %27 {strides = array<i32>} : memref<8x8x16xf32, #tpu.memory_space<vmem>>, vector<4x8x16xf32>,
    %c2_i32 = arith.constant 2 : i32
    return
  }
  func.func @transform_0(%arg0: i32) -> (i32, i32, i32) {
    %c0_i32 = arith.constant 0 : i32
    %c0_i32_0 = arith.constant 0 : i32
    %c0_i32_1 = arith.constant 0 : i32
    return %arg0, %c0_i32, %c0_i32_0 : i32, i32, i32
  }
  func.func @transform_1(%arg0: i32) -> (i32, i32, i32) {
    %c0_i32 = arith.constant 0 : i32
    %c0_i32_0 = arith.constant 0 : i32
    %c0_i32_1 = arith.constant 0 : i32
    return %arg0, %c0_i32, %c0_i32_0 : i32, i32, i32
  }
  func.func @transform_2(%arg0: i32) -> (i32, i32, i32) {
    %c0_i32 = arith.constant 0 : i32
    %c0_i32_0 = arith.constant 0 : i32
    %c0_i32_1 = arith.constant 0 : i32
    return %arg0, %c0_i32, %c0_i32_0 : i32, i32, i32
  }
  func.func @transform_3(%arg0: i32) -> (i32, i32, i32) {
    %c0_i32 = arith.constant 0 : i32
    %c0_i32_0 = arith.constant 0 : i32
    %c0_i32_1 = arith.constant 0 : i32
    return %arg0, %c0_i32, %c0_i32_0 : i32, i32, i32
  }
  func.func @transform_4(%arg0: i32) -> (i32, i32, i32) {
    %c0_i32 = arith.constant 0 : i32
    %c0_i32_0 = arith.constant 0 : i32
    %c0_i32_1 = arith.constant 0 : i32
    return %arg0, %c0_i32, %c0_i32_0 : i32, i32, i32
  }
  func.func @transform_5(%arg0: i32) -> (i32, i32, i32) {
    %c0_i32 = arith.constant 0 : i32
    %c0_i32_0 = arith.constant 0 : i32
    %c0_i32_1 = arith.constant 0 : i32
    return %arg0, %c0_i32, %c0_i32_0 : i32, i32, i32
  }
}

</mosaic_0001>

<bundles_post_ra>
// kernel: tpu_custom_call.1
= control target key start
LH: loop header
LB: loop body
LE: loop exit
PB: predicated region body
PF: predicated region fallthrough
CT: control target
= control target key end

     0   :  { %11 = vsyncpa [#allocation3], 0  ;;  %vm67_vm0 = vcmask 261120   ;;  %s969_s0 = inlined_call_operand.vmem [shape: f32[8,8,32], index: 0, kind: input, shape index: {}]   ;;  %s970_s1 = inlined_call_operand.vmem [shape: f32[8,32,16], index: 1, kind: input, shape index: {}]   ;;  %s971_s2 = inlined_call_operand.vmem [shape: f32[8,8,32], index: 2, kind: input, shape index: {}]   ;;  %s972_s3 = inlined_call_operand.vmem [shape: f32[8,32,16], index: 3, kind: input, shape index: {}]   ;;  %s973_s4 = inlined_call_operand.hbm [shape: f32[8,8,16], index: 4, kind: output, shape index: {0}]   ;;  %s974_s5 = inlined_call_operand.hbm [shape: f32[8,8,16], index: 5, kind: output, shape index: {1}]  }
   0x1   :  { %v40_v0 = vld [vmem:[%s970_s1 + $0x58] sm:$0xff]  ;;  %v39_v2 = vld [vmem:[%s970_s1 + $0x50] sm:$0xff]  ;;  %v38_v4 = vld [vmem:[%s970_s1 + $0x48] sm:$0xff] }
   0x2   :  { %v44_v1 = vld [vmem:[%s970_s1 + $0x78] sm:$0xff]  ;;  %129 = vmatpush.msra.mxu2 %v40_v0  ;;  %v43_v3 = vld [vmem:[%s970_s1 + $0x70] sm:$0xff]  ;;  %v42_v5 = vld [vmem:[%s970_s1 + $0x68] sm:$0xff] }
   0x3   :  { %152 = vmatpush.msra.mxu3 %v44_v1  ;;  %v32_v6 = vld [vmem:[%s970_s1 + $0x18] sm:$0xff]  ;;  %v37_v8 = vld [vmem:[%s970_s1 + $0x40] sm:$0xff]  ;;  %v31_v10 = vld [vmem:[%s970_s1 + $0x10] sm:$0xff] }
   0x4   :  { %v36_v7 = vld [vmem:[%s970_s1 + $0x38] sm:$0xff]  ;;  %130 = vmatpush.msra.mxu2 %v39_v2  ;;  %83 = vmatpush.msra.mxu0 %v32_v6  ;;  %v41_v9 = vld [vmem:[%s970_s1 + $0x60] sm:$0xff]  ;;  %v25_v11 = vld [vmem:[%s969_s0 + $0x10] sm:$0xff] }
   0x5   :  { %153 = vmatpush.msra.mxu3 %v43_v3  ;;  %106 = vmatpush.msra.mxu1 %v36_v7  ;;  %v26_v12 = vld [vmem:[%s969_s0 + $0x18] sm:$0xff]  ;;  %v35_v13 = vld [vmem:[%s970_s1 + $0x30] sm:$0xff]  ;;  %v30_v16 = vld [vmem:[%s970_s1 + $0x8] sm:$0xff] }
   0x6   :  { %131 = vmatpush.msra.mxu2 %v38_v4  ;;  %v62_v14 = vld [vmem:[%s972_s3 + $0x58] sm:$0xff]  ;;  %84 = vmatpush.msra.mxu0 %v31_v10  ;;  %v34_v17 = vld [vmem:[%s970_s1 + $0x28] sm:$0xff]  ;;  %v61_v18 = vld [vmem:[%s972_s3 + $0x50] sm:$0xff] }
   0x7   :  { %154 = vmatpush.msra.mxu3 %v42_v5  ;;  %v66_v15 = vld [vmem:[%s972_s3 + $0x78] sm:$0xff]  ;;  %107 = vmatpush.msra.mxu1 %v35_v13  ;;  %v65_v19 = vld [vmem:[%s972_s3 + $0x70] sm:$0xff]  ;;  %v29_v20 = vld [vmem:[%s970_s1] sm:$0xff] }
   0x8   :  { %132 = vmatpush.msra.mxu2 %v37_v8  ;;  %v33_v21 = vld [vmem:[%s970_s1 + $0x20] sm:$0xff]  ;;  %85 = vmatpush.msra.mxu0 %v30_v16  ;;  %v60_v22 = vld [vmem:[%s972_s3 + $0x48] sm:$0xff]  ;;  %v54_v26 = vld [vmem:[%s972_s3 + $0x18] sm:$0xff] }
   0x9   :  { %155 = vmatpush.msra.mxu3 %v41_v9  ;;  %547 = vmatmul.msk.f32.vlgmr.msra.gmra.mxu2 %vm67_vm0, %v25_v11  ;;  %v64_v23 = vld [vmem:[%s972_s3 + $0x68] sm:$0xff]  ;;  %v23_v24 = vld [vmem:[%s969_s0] sm:$0xff]  ;;  %v58_v27 = vld [vmem:[%s972_s3 + $0x38] sm:$0xff] }
   0xa   :  { %548 = vmatmul.msk.f32.vlgmr.msra.gmra.mxu3 %vm67_vm0, %v26_v12  ;;  %221 = vmatpush.msrb.mxu2 %v62_v14  ;;  %v24_v25 = vld [vmem:[%s969_s0 + $0x8] sm:$0xff]  ;;  %v59_v28 = vld [vmem:[%s972_s3 + $0x40] sm:$0xff]  ;;  %v53_v30 = vld [vmem:[%s972_s3 + $0x10] sm:$0xff] }
   0xb   :  { %244 = vmatpush.msrb.mxu3 %v66_v15  ;;  %108 = vmatpush.msra.mxu1 %v34_v17  ;;  %v63_v29 = vld [vmem:[%s972_s3 + $0x60] sm:$0xff]  ;;  %v57_v31 = vld [vmem:[%s972_s3 + $0x30] sm:$0xff]  ;;  %v49_v33 = vld [vmem:[%s971_s2 + $0x18] sm:$0xff] }
   0xc   :  { %222 = vmatpush.msrb.mxu2 %v61_v18  ;;  %86 = vmatpush.msra.mxu0 %v29_v20  ;;  %v48_v32 = vld [vmem:[%s971_s2 + $0x10] sm:$0xff]  ;;  %v568_v34 = vld [vmem:[%s970_s1 + $0xd8] sm:$0xff]  ;;  %v52_v36 = vld [vmem:[%s972_s3 + $0x8] sm:$0xff] }
   0xd   :  { %245 = vmatpush.msrb.mxu3 %v65_v19  ;;  %109 = vmatpush.msra.mxu1 %v33_v21  ;;  %v572_v35 = vld [vmem:[%s970_s1 + $0xf8] sm:$0xff]  ;;  %v56_v37 = vld [vmem:[%s972_s3 + $0x28] sm:$0xff]  ;;  %v567_v38 = vld [vmem:[%s970_s1 + $0xd0] sm:$0xff] }
   0xe   :  { %223 = vmatpush.msrb.mxu2 %v60_v22  ;;  %545 = vmatmul.msk.f32.vlgmr.msra.gmra.mxu0 %vm67_vm0, %v23_v24  ;;  %v571_v39 = vld [vmem:[%s970_s1 + $0xf0] sm:$0xff]  ;;  %v51_v40 = vld [vmem:[%s972_s3] sm:$0xff]  ;;  %v566_v42 = vld [vmem:[%s970_s1 + $0xc8] sm:$0xff] }
   0xf   :  { %246 = vmatpush.msrb.mxu3 %v64_v23  ;;  %546 = vmatmul.msk.f32.vlgmr.msra.gmra.mxu1 %vm67_vm0, %v24_v25  ;;  %v55_v41 = vld [vmem:[%s972_s3 + $0x20] sm:$0xff]  ;;  %v570_v43 = vld [vmem:[%s970_s1 + $0xe8] sm:$0xff]  ;;  %v560_v46 = vld [vmem:[%s970_s1 + $0x98] sm:$0xff] }
  0x10   :  { %175 = vmatpush.msrb.mxu0 %v54_v26  ;;  %198 = vmatpush.msrb.mxu1 %v58_v27  ;;  %v46_v44 = vld [vmem:[%s971_s2] sm:$0xff]  ;;  %v47_v45 = vld [vmem:[%s971_s2 + $0x8] sm:$0xff]  ;;  %v564_v47 = vld [vmem:[%s970_s1 + $0xb8] sm:$0xff] }
  0x11   :  { %224 = vmatpush.msrb.mxu2 %v59_v28  ;;  %247 = vmatpush.msrb.mxu3 %v63_v29  ;;  %v565_v48 = vld [vmem:[%s970_s1 + $0xc0] sm:$0xff]  ;;  %v559_v50 = vld [vmem:[%s970_s1 + $0x90] sm:$0xff]  ;;  %v556_v53 = vld [vmem:[%s969_s0 + $0x38] sm:$0xff] }
  0x12   :  { %176 = vmatpush.msrb.mxu0 %v53_v30  ;;  %199 = vmatpush.msrb.mxu1 %v57_v31  ;;  %v569_v49 = vld [vmem:[%s970_s1 + $0xe0] sm:$0xff]  ;;  %v563_v51 = vld [vmem:[%s970_s1 + $0xb0] sm:$0xff]  ;;  %v588_v54 = vld [vmem:[%s972_s3 + $0xd8] sm:$0xff] }
  0x13   :  { %551 = vmatmul.msk.f32.vlgmr.msrb.gmra.mxu2 %vm67_vm0, %v48_v32  ;;  %552 = vmatmul.msk.f32.vlgmr.msrb.gmra.mxu3 %vm67_vm0, %v49_v33  ;;  %v555_v52 = vld [vmem:[%s969_s0 + $0x30] sm:$0xff]  ;;  %v592_v55 = vld [vmem:[%s972_s3 + $0xf8] sm:$0xff] }
  0x14   :  { %370 = vmatpush.msra.mxu2 %v568_v34  ;;  %393 = vmatpush.msra.mxu3 %v572_v35 }
  0x15   :  { %177 = vmatpush.msrb.mxu0 %v52_v36  ;;  %200 = vmatpush.msrb.mxu1 %v56_v37 }
  0x16   :  { %371 = vmatpush.msra.mxu2 %v567_v38  ;;  %394 = vmatpush.msra.mxu3 %v571_v39 }
  0x17   :  { %178 = vmatpush.msrb.mxu0 %v51_v40  ;;  %201 = vmatpush.msrb.mxu1 %v55_v41 }
  0x18   :  { %372 = vmatpush.msra.mxu2 %v566_v42  ;;  %395 = vmatpush.msra.mxu3 %v570_v43 }
  0x19   :  { %549 = vmatmul.msk.f32.vlgmr.msrb.gmra.mxu0 %vm67_vm0, %v46_v44  ;;  %550 = vmatmul.msk.f32.vlgmr.msrb.gmra.mxu1 %vm67_vm0, %v47_v45 }
  0x1a   :  { %324 = vmatpush.msra.mxu0 %v560_v46  ;;  %347 = vmatpush.msra.mxu1 %v564_v47 }
  0x1b   :  { %373 = vmatpush.msra.mxu2 %v565_v48  ;;  %396 = vmatpush.msra.mxu3 %v569_v49 }
  0x1c   :  { %12 = vsyncpa [#allocation5], 0  ;;  %325 = vmatpush.msra.mxu0 %v559_v50  ;;  %348 = vmatpush.msra.mxu1 %v563_v51  ;;  %v558_v56 = vld [vmem:[%s970_s1 + $0x88] sm:$0xff]  ;;  %v587_v58 = vld [vmem:[%s972_s3 + $0xd0] sm:$0xff]  ;;  %vm253_vm1 = vcmask 130048   ;;  %s509_s27 = sshll.u32 %s973_s4, 4  ;;  %s510_s27 = int_to_ptr.hbm [resolvable:$true] %s509_s27 }
  0x1d   :  { %v562_v57 = vld [vmem:[%s970_s1 + $0xa8] sm:$0xff]  ;;  %595 = vmatmul.msk.f32.vlgmr.msra.gmra.mxu2 %vm67_vm0, %v555_v52  ;;  %596 = vmatmul.msk.f32.vlgmr.msra.gmra.mxu3 %vm67_vm0, %v556_v53  ;;  %v591_v59 = vld [vmem:[%s972_s3 + $0xf0] sm:$0xff]  ;;  %v557_v60 = vld [vmem:[%s970_s1 + $0x80] sm:$0xff]  ;;  %s658_s28 = smov 128   ;;  %s659_s29 = smov 8  }
  0x1e   :  { %462 = vmatpush.msrb.mxu2 %v588_v54  ;;  %485 = vmatpush.msrb.mxu3 %v592_v55  ;;  %v561_v61 = vld [vmem:[%s970_s1 + $0xa0] sm:$0xff]  ;;  %v586_v62 = vld [vmem:[%s972_s3 + $0xc8] sm:$0xff]  ;;  %v580_v2 = vld [vmem:[%s972_s3 + $0x98] sm:$0xff]  ;;  %s660_s30 = smov [#allocation4]   ;;  %s522_s7 = sshll.u32 %s974_s5, 4  ;;  %s523_s7 = int_to_ptr.hbm [resolvable:$true] %s522_s7 }
  0x1f   :  { %326 = vmatpush.msra.mxu0 %v558_v56  ;;  %349 = vmatpush.msra.mxu1 %v562_v57  ;;  %v590_v63 = vld [vmem:[%s972_s3 + $0xe8] sm:$0xff]  ;;  %v553_v0 = vld [vmem:[%s969_s0 + $0x20] sm:$0xff]  ;;  %v584_v3 = vld [vmem:[%s972_s3 + $0xb8] sm:$0xff]  ;;  %s520_s6 = sshll.u32 %s660_s30, 4  ;;  %s521_s6 = int_to_ptr.vmem [resolvable:$true] %s520_s6 }
  0x20   :  { %463 = vmatpush.msrb.mxu2 %v587_v58  ;;  %486 = vmatpush.msrb.mxu3 %v591_v59  ;;  %v554_v1 = vld [vmem:[%s969_s0 + $0x28] sm:$0xff]  ;;  %v585_v4 = vld [vmem:[%s972_s3 + $0xc0] sm:$0xff]  ;;  %v579_v6 = vld [vmem:[%s972_s3 + $0x90] sm:$0xff] }
  0x21   :  { %327 = vmatpush.msra.mxu0 %v557_v60  ;;  %350 = vmatpush.msra.mxu1 %v561_v61  ;;  %v589_v5 = vld [vmem:[%s972_s3 + $0xe0] sm:$0xff]  ;;  %v583_v7 = vld [vmem:[%s972_s3 + $0xb0] sm:$0xff]  ;;  %v576_v9 = vld [vmem:[%s971_s2 + $0x38] sm:$0xff] }
  0x22   :  { %464 = vmatpush.msrb.mxu2 %v586_v62  ;;  %487 = vmatpush.msrb.mxu3 %v590_v63  ;;  %v575_v8 = vld [vmem:[%s971_s2 + $0x30] sm:$0xff]  ;;  %v578_v10 = vld [vmem:[%s972_s3 + $0x88] sm:$0xff]  ;;  %v577_v12 = vld [vmem:[%s972_s3 + $0x80] sm:$0xff] }
  0x23   :  { %593 = vmatmul.msk.f32.vlgmr.msra.gmra.mxu0 %vm67_vm0, %v553_v0  ;;  %594 = vmatmul.msk.f32.vlgmr.msra.gmra.mxu1 %vm67_vm0, %v554_v1  ;;  %v582_v11 = vld [vmem:[%s972_s3 + $0xa8] sm:$0xff]  ;;  %v581_v13 = vld [vmem:[%s972_s3 + $0xa0] sm:$0xff] }
  0x24   :  { %416 = vmatpush.msrb.mxu0 %v580_v2  ;;  %439 = vmatpush.msrb.mxu1 %v584_v3  ;;  %v573_v14 = vld [vmem:[%s971_s2 + $0x20] sm:$0xff]  ;;  %v574_v15 = vld [vmem:[%s971_s2 + $0x28] sm:$0xff]  ;;  %s657_s2 = smov [#allocation2]  }
  0x25   :  { %465 = vmatpush.msrb.mxu2 %v585_v4  ;;  %488 = vmatpush.msrb.mxu3 %v589_v5  ;;  %s507_s3 = sshll.u32 %s657_s2, 4  ;;  %s508_s3 = int_to_ptr.vmem [resolvable:$true] %s507_s3 }
  0x26   :  { %417 = vmatpush.msrb.mxu0 %v579_v6  ;;  %440 = vmatpush.msrb.mxu1 %v583_v7 }
  0x27   :  { %599 = vmatmul.msk.f32.vlgmr.msrb.gmra.mxu2 %vm67_vm0, %v575_v8  ;;  %600 = vmatmul.msk.f32.vlgmr.msrb.gmra.mxu3 %vm67_vm0, %v576_v9 }
  0x28   :  { %418 = vmatpush.msrb.mxu0 %v578_v10  ;;  %441 = vmatpush.msrb.mxu1 %v582_v11 }
  0x2a   :  { %419 = vmatpush.msrb.mxu0 %v577_v12  ;;  %442 = vmatpush.msrb.mxu1 %v581_v13 }
  0x2b   :  { %597 = vmatmul.msk.f32.vlgmr.msrb.gmra.mxu0 %vm67_vm0, %v573_v14  ;;  %598 = vmatmul.msk.f32.vlgmr.msrb.gmra.mxu1 %vm67_vm0, %v574_v15 }
  0x8b   :  { %v88_v16 = vpop.f32.mrf.mxu0 }
  0x8c   :  { %v111_v17 = vpop.f32.mrf.mxu1  ;;  %254 = vst.msk [vmem:[#allocation2] sm:$0xff] %vm253_vm1, %v88_v16  ;;  %v134_v18 = vpop.f32.mrf.mxu2 }
  0x8d   :  { %v157_v19 = vpop.f32.mrf.mxu3  ;;  %255 = vst.msk [vmem:[#allocation2 + $0x8] sm:$0xff] %vm253_vm1, %v111_v17 }
  0x8e   :  { %256 = vst.msk [vmem:[#allocation2 + $0x10] sm:$0xff] %vm253_vm1, %v134_v18 }
  0x8f   :  { %257 = vst.msk [vmem:[#allocation2 + $0x18] sm:$0xff] %vm253_vm1, %v157_v19 }
  0x96   :  { %v180_v20 = vpop.f32.mrf.mxu0  ;;  %v203_v21 = vpop.f32.mrf.mxu1 }
  0x97   :  { %259 = vst.msk [vmem:[#allocation4] sm:$0xff] %vm253_vm1, %v180_v20  ;;  %v226_v22 = vpop.f32.mrf.mxu2  ;;  %v249_v23 = vpop.f32.mrf.mxu3 }
  0x98   :  { %260 = vst.msk [vmem:[#allocation4 + $0x8] sm:$0xff] %vm253_vm1, %v203_v21 }
  0x99   :  { %261 = vst.msk [vmem:[#allocation4 + $0x10] sm:$0xff] %vm253_vm1, %v226_v22 }
  0x9a   :  { %262 = vst.msk [vmem:[#allocation4 + $0x18] sm:$0xff] %vm253_vm1, %v249_v23 }
  0xa0   :  { %v329_v24 = vpop.f32.mrf.mxu0  ;;  %v352_v25 = vpop.f32.mrf.mxu1 }
  0xa1   :  { %494 = vst.msk [vmem:[#allocation2 + $0x20] sm:$0xff] %vm253_vm1, %v329_v24  ;;  %v375_v26 = vpop.f32.mrf.mxu2  ;;  %v398_v27 = vpop.f32.mrf.mxu3 }
  0xa2   :  { %495 = vst.msk [vmem:[#allocation2 + $0x28] sm:$0xff] %vm253_vm1, %v352_v25 }
  0xa3   :  { %496 = vst.msk [vmem:[#allocation2 + $0x30] sm:$0xff] %vm253_vm1, %v375_v26 }
  0xa4   :  { %497 = vst.msk [vmem:[#allocation2 + $0x38] sm:$0xff] %vm253_vm1, %v398_v27 }
  0xa5   :  { %515 = dma.vmem_to_hbm [thread:$0]  %s508_s3, 1024, %s510_s27, [#allocation3], %s658_s28, %s658_s28, %s659_s29  }
  0xa8   :  { %v421_v28 = vpop.f32.mrf.mxu0  ;;  %v444_v29 = vpop.f32.mrf.mxu1 }
  0xa9   :  { %499 = vst.msk [vmem:[#allocation4 + $0x20] sm:$0xff] %vm253_vm1, %v421_v28 }
  0xaa   :  { %500 = vst.msk [vmem:[#allocation4 + $0x28] sm:$0xff] %vm253_vm1, %v444_v29  ;;  %v467_v30 = vpop.f32.mrf.mxu2  ;;  %v490_v31 = vpop.f32.mrf.mxu3 }
  0xab   :  { %501 = vst.msk [vmem:[#allocation4 + $0x30] sm:$0xff] %vm253_vm1, %v467_v30 }
  0xac   :  { %502 = vst.msk [vmem:[#allocation4 + $0x38] sm:$0xff] %vm253_vm1, %v490_v31 }
  0xad   :  { %528 = dma.vmem_to_hbm [thread:$0]  %s521_s6, 1024, %s523_s7, [#allocation5], %s658_s28, %s658_s28, %s659_s29  }
  0xae   :  { %653 = dma.done.wait [#allocation3], 1024  }
  0xaf   :  { %654 = vsyncadd [#allocation3], 4294966272 }
  0xb0   :  { %655 = dma.done.wait [#allocation5], 1024  }
  0xb1   :  { %656 = vsyncadd [#allocation5], 4294966272 }
  0xb2   :  { %537 = vsyncpa [#allocation3], 1 }
  0xb3   :  { %538 = vsyncpa [#allocation5], 1 }

</bundles_post_ra>
